<compile_context>
chip_gen: v7x
topology: tpu7x:2x2x1
jax: 0.10.0
libtpu: 0.0.40
codegen_flags: <defaults>
</compile_context>

<pallas_src>
import jax
import jax.numpy as jnp
from jax import lax
from jax.experimental import pallas as pl
from jax.experimental.pallas import tpu as pltpu

GRID = 2            # module hard-codes self.grid = 2
G = GRID ** 2       # 4


def mlp_cosine_kernel(x_ref, w_ref, b_ref, y_ref, o_ref):
    # x_ref: (TB, D)         w_ref: (D, D4)      b_ref: (1, D4) f32
    # y_ref: (G, TB, D4)     o_ref: (TB, G)
    h = jnp.tanh(
        jnp.dot(x_ref[...], w_ref[...], preferred_element_type=jnp.float32)
        + b_ref[...]
    )                                                       # (TB, D4) f32
    hx = jnp.sum(h * h, axis=-1, keepdims=True)             # (TB, 1)

    cols = []
    for g in range(G):                                      # static unroll, G == 4
        yg = y_ref[g].astype(jnp.float32)                   # (TB, D4) lane-dense
        num = jnp.sum(h * yg, axis=-1, keepdims=True)       # (TB, 1)
        hy = jnp.sum(yg * yg, axis=-1, keepdims=True)       # (TB, 1)
        cols.append(num * lax.rsqrt(hx * hy))               # EUP rsqrt, no divide
    o_ref[...] = jnp.concatenate(cols, axis=-1).astype(o_ref.dtype)


def _pick_block_b(B, block_b=None, target=256):
    """Batch-tile size: multiple of 8 dividing B, capped at `target` rows."""
    if block_b is not None:
        assert B % block_b == 0, "block_b must divide batch"
        return block_b
    if B <= target:
        return B
    for tb in range(target, 7, -1):
        if B % tb == 0 and tb % 8 == 0:
            return tb
    return B  # fallback: single tile


def mlp_net_forward(x, y, w1_t, b1, *, block_b=None, use_bf16=False):
    """x: (B, in_dim), y: (B, in_dim), w1_t: (in_dim, in_dim//4), b1: (in_dim//4,)

    use_bf16=True casts x / W / y to bf16 for the MXU + input DMA (v6e/v7x fast
    path); accumulation and all post-matmul math stay in f32.
    """
    B, D = x.shape
    D4 = D // 4
    assert D4 * G == D, "in_dim must be divisible by 4"
    assert y.shape == (B, D), "y must reshape to (B, in_dim/4, grid^2)"

    # Lane-dense y layout: (G, B, D4). Pure wrapper-side transpose of the
    # reshape; each per-g slab is a clean (TB, D4) tile with D4 on lanes.
    y_t = jnp.transpose(y.reshape(B, D4, G), (2, 0, 1))

    if use_bf16:
        x_in = x.astype(jnp.bfloat16)
        w_in = w1_t.astype(jnp.bfloat16)
        y_in = y_t.astype(jnp.bfloat16)
    else:
        x_in, w_in, y_in = x, w1_t, y_t
    b_in = b1.reshape(1, D4).astype(jnp.float32)

    tb = _pick_block_b(B, block_b)
    grid = (B // tb,)

    out_dtype = x.dtype
    bytes_accessed = int(
        x_in.size * x_in.dtype.itemsize
        + y_in.size * y_in.dtype.itemsize
        + w_in.size * w_in.dtype.itemsize
        + b_in.size * 4
        + B * G * jnp.dtype(out_dtype).itemsize
    )
    cost = pl.CostEstimate(
        flops=int(2 * B * D * D4 + 8 * B * D4 * G),
        transcendentals=int(B * D4 + B * G),
        bytes_accessed=bytes_accessed,
    )

    return pl.pallas_call(
        mlp_cosine_kernel,
        out_shape=jax.ShapeDtypeStruct((B, G), out_dtype),
        grid_spec=pltpu.PrefetchScalarGridSpec(
            num_scalar_prefetch=0,
            grid=grid,
            in_specs=[
                pl.BlockSpec((tb, D), lambda i: (i, 0)),       # x: batch-tiled
                pl.BlockSpec((D, D4), lambda i: (0, 0)),       # W: resident
                pl.BlockSpec((1, D4), lambda i: (0, 0)),       # bias: resident
                pl.BlockSpec((G, tb, D4), lambda i: (0, i, 0)),  # y: batch-tiled
            ],
            out_specs=pl.BlockSpec((tb, G), lambda i: (i, 0)),
        ),
        compiler_params=pltpu.CompilerParams(
            dimension_semantics=("parallel",),  # megacore sharding on v7x
        ),
        cost_estimate=cost,
    )(x_in, w_in, b_in, y_in)


def _reference(x, y, w1_t, b1):
    """Plain-JAX reference mirroring the PyTorch forward."""
    B, D = x.shape
    D4 = D // 4
    h = jnp.tanh(x @ w1_t + b1)                              # (B, D4)
    x3 = jnp.broadcast_to(h[:, :, None], (B, D4, G))
    y3 = y.reshape(B, D4, G)
    xy = jnp.sqrt(jnp.sum(x3 ** 2, axis=1) * jnp.sum(y3 ** 2, axis=1))
    return jnp.sum(x3 * y3, axis=1) / xy


if __name__ == "__main__":
    # Small but tile-friendly shapes: B=64 rows, in_dim=512 -> D4=128.
    B, in_dim = 64, 512
    D4 = in_dim // 4

    key = jax.random.PRNGKey(0)
    kx, ky, kw, kb = jax.random.split(key, 4)

    x = jax.random.normal(kx, (B, in_dim), dtype=jnp.float32)
    y = jax.random.normal(ky, (B, in_dim), dtype=jnp.float32)

    # fc1: Linear(in_dim, in_dim//4); xavier-normal weight (deterministic, synthetic).
    # fc2..fc5 are never used in forward(), so they are omitted.
    xavier_std = (2.0 / (in_dim + D4)) ** 0.5
    w1 = xavier_std * jax.random.normal(kw, (D4, in_dim), dtype=jnp.float32)  # (out, in)
    b1 = 0.01 * jax.random.normal(kb, (D4,), dtype=jnp.float32)
    w1_t = w1.T                                                               # (in_dim, D4)

    ref = _reference(x, y, w1_t, b1)

    # f32 path (exact forward semantics), batch-tiled grid of 4 tiles.
    out = jax.block_until_ready(mlp_net_forward(x, y, w1_t, b1, block_b=16))
    assert out.shape == (B, G)
    assert jnp.allclose(out, ref, atol=1e-4, rtol=1e-4), (out, ref)

    # bf16 MXU-input fast path (v6e/v7x); f32 accumulation, looser tolerance.
    out_bf16 = jax.block_until_ready(
        mlp_net_forward(x, y, w1_t, b1, block_b=16, use_bf16=True)
    )
    assert out_bf16.shape == (B, G)
    assert jnp.allclose(out_bf16, ref, atol=3e-2, rtol=3e-2), (out_bf16, ref)

    print("KERNEL_OK")
</pallas_src>

<mosaic_0001>
module attributes {stable_mosaic.version = 11 : i64} {
  func.func @mlp_cosine_kernel(%arg0: i32, %arg1: memref<16x512xf32, #tpu.memory_space<vmem>>, %arg2: memref<512x128xf32, #tpu.memory_space<vmem>>, %arg3: memref<1x128xf32, #tpu.memory_space<vmem>>, %arg4: memref<4x16x128xf32, #tpu.memory_space<vmem>>, %arg5: memref<16x4xf32, #tpu.memory_space<vmem>>) attributes {dimension_semantics = [#tpu.dimension_semantics<parallel>], iteration_bounds = array<i64: 4>, scalar_prefetch = 0 : i64, scratch_operands = 0 : i64, tpu.core_type = #tpu.core_type<tc>, window_params = [{transform_indices = @transform_0, window_bounds = array<i64: 16, 512>}, {pipeline_mode = #tpu.pipeline_mode<synchronous>, transform_indices = @transform_1, window_bounds = array<i64: 512, 128>}, {pipeline_mode = #tpu.pipeline_mode<synchronous>, transform_indices = @transform_2, window_bounds = array<i64: 1, 128>}, {transform_indices = @transform_3, window_bounds = array<i64: 4, 16, 128>}, {transform_indices = @transform_4, window_bounds = array<i64: 16, 4>}]} {
    %c0 = arith.constant 0 : index
    %c0_0 = arith.constant 0 : index
    %0 = vector.load %arg1[%c0, %c0_0] : memref<16x512xf32, #tpu.memory_space<vmem>>, vector<16x512xf32>
    %c0_1 = arith.constant 0 : index
    %c0_2 = arith.constant 0 : index
    %1 = vector.load %arg2[%c0_1, %c0_2] : memref<512x128xf32, #tpu.memory_space<vmem>>, vector<512x128xf32>
    %cst = arith.constant dense<0.000000e+00> : vector<16x128xf32>
    %2 = tpu.matmul %0, %1, %cst {dimension_numbers = #tpu.dot_dimension_numbers<[1], [0], [0], [1], [0, 0, 1, 1], [], []>} : vector<16x512xf32>, vector<512x128xf32>, vector<16x128xf32> -> vector<16x128xf32>
    %c0_3 = arith.constant 0 : index
    %c0_4 = arith.constant 0 : index
    %3 = vector.load %arg3[%c0_3, %c0_4] : memref<1x128xf32, #tpu.memory_space<vmem>>, vector<1x128xf32>
    %4 = vector.broadcast %3 : vector<1x128xf32> to vector<16x128xf32>
    %5 = arith.addf %2, %4 : vector<16x128xf32>
    %6 = math.tanh %5 : vector<16x128xf32>
    %7 = arith.mulf %6, %6 : vector<16x128xf32>
    %cst_5 = arith.constant dense<0.000000e+00> : vector<16xf32>
    %8 = vector.multi_reduction <add>, %7, %cst_5 [1] : vector<16x128xf32> to vector<16xf32>
    %9 = vector.shape_cast %8 : vector<16xf32> to vector<16x1xf32>
    %c0_6 = arith.constant 0 : index
    %c0_7 = arith.constant 0 : index
    %c0_8 = arith.constant 0 : index
    %10 = vector.load %arg4[%c0_6, %c0_7, %c0_8] : memref<4x16x128xf32, #tpu.memory_space<vmem>>, vector<1x16x128xf32>
    %11 = vector.shape_cast %10 : vector<1x16x128xf32> to vector<16x128xf32>
    %12 = arith.mulf %6, %11 : vector<16x128xf32>
    %cst_9 = arith.constant dense<0.000000e+00> : vector<16xf32>
    %13 = vector.multi_reduction <add>, %12, %cst_9 [1] : vector<16x128xf32> to vector<16xf32>
    %14 = vector.shape_cast %13 : vector<16xf32> to vector<16x1xf32>
    %15 = arith.mulf %11, %11 : vector<16x128xf32>
    %cst_10 = arith.constant dense<0.000000e+00> : vector<16xf32>
    %16 = vector.multi_reduction <add>, %15, %cst_10 [1] : vector<16x128xf32> to vector<16xf32>
    %17 = vector.shape_cast %16 : vector<16xf32> to vector<16x1xf32>
    %18 = arith.mulf %9, %17 : vector<16x1xf32>
    %19 = math.rsqrt %18 : vector<16x1xf32>
    %20 = arith.mulf %14, %19 : vector<16x1xf32>
    %c1 = arith.constant 1 : index
    %c0_11 = arith.constant 0 : index
    %c0_12 = arith.constant 0 : index
    %21 = vector.load %arg4[%c1, %c0_11, %c0_12] : memref<4x16x128xf32, #tpu.memory_space<vmem>>, vector<1x16x128xf32>
    %22 = vector.shape_cast %21 : vector<1x16x128xf32> to vector<16x128xf32>
    %23 = arith.mulf %6, %22 : vector<16x128xf32>
    %cst_13 = arith.constant dense<0.000000e+00> : vector<16xf32>
    %24 = vector.multi_reduction <add>, %23, %cst_13 [1] : vector<16x128xf32> to vector<16xf32>
    %25 = vector.shape_cast %24 : vector<16xf32> to vector<16x1xf32>
    %26 = arith.mulf %22, %22 : vector<16x128xf32>
    %cst_14 = arith.constant dense<0.000000e+00> : vector<16xf32>
    %27 = vector.multi_reduction <add>, %26, %cst_14 [1] : vector<16x128xf32> to vector<16xf32>
    %28 = vector.shape_cast %27 : vector<16xf32> to vector<16x1xf32>
    %29 = arith.mulf %9, %28 : vector<16x1xf32>
    %30 = math.rsqrt %29 : vector<16x1xf32>
    %31 = arith.mulf %25, %30 : vector<16x1xf32>
    %c2 = arith.constant 2 : index
    %c0_15 = arith.constant 0 : index
    %c0_16 = arith.constant 0 : index
    %32 = vector.load %arg4[%c2, %c0_15, %c0_16] : memref<4x16x128xf32, #tpu.memory_space<vmem>>, vector<1x16x128xf32>
    %33 = vector.shape_cast %32 : vector<1x16x128xf32> to vector<16x128xf32>
    %34 = arith.mulf %6, %33 : vector<16x128xf32>
    %cst_17 = arith.constant dense<0.000000e+00> : vector<16xf32>
    %35 = vector.multi_reduction <add>, %34, %cst_17 [1] : vector<16x128xf32> to vector<16xf32>
    %36 = vector.shape_cast %35 : vector<16xf32> to vector<16x1xf32>
    %37 = arith.mulf %33, %33 : vector<16x128xf32>
    %cst_18 = arith.constant dense<0.000000e+00> : vector<16xf32>
    %38 = vector.multi_reduction <add>, %37, %cst_18 [1] : vector<16x128xf32> to vector<16xf32>
    %39 = vector.shape_cast %38 : vector<16xf32> to vector<16x1xf32>
    %40 = arith.mulf %9, %39 : vector<16x1xf32>
    %41 = math.rsqrt %40 : vector<16x1xf32>
    %42 = arith.mulf %36, %41 : vector<16x1xf32>
    %c3 = arith.constant 3 : index
    %c0_19 = arith.constant 0 : index
    %c0_20 = arith.constant 0 : index
    %43 = vector.load %arg4[%c3, %c0_19, %c0_20] : memref<4x16x128xf32, #tpu.memory_space<vmem>>, vector<1x16x128xf32>
    %44 = vector.shape_cast %43 : vector<1x16x128xf32> to vector<16x128xf32>
    %45 = arith.mulf %6, %44 : vector<16x128xf32>
    %cst_21 = arith.constant dense<0.000000e+00> : vector<16xf32>
    %46 = vector.multi_reduction <add>, %45, %cst_21 [1] : vector<16x128xf32> to vector<16xf32>
    %47 = vector.shape_cast %46 : vector<16xf32> to vector<16x1xf32>
    %48 = arith.mulf %44, %44 : vector<16x128xf32>
    %cst_22 = arith.constant dense<0.000000e+00> : vector<16xf32>
    %49 = vector.multi_reduction <add>, %48, %cst_22 [1] : vector<16x128xf32> to vector<16xf32>
    %50 = vector.shape_cast %49 : vector<16xf32> to vector<16x1xf32>
    %51 = arith.mulf %9, %50 : vector<16x1xf32>
    %52 = math.rsqrt %51 : vector<16x1xf32>
    %53 = arith.mulf %47, %52 : vector<16x1xf32>
    %54 = tpu.concatenate %20, %31, %42, %53 in 1 : vector<16x1xf32>, vector<16x1xf32>, vector<16x1xf32>, vector<16x1xf32> -> vector<16x4xf32>
    %c0_23 = arith.constant 0 : index
    %c0_24 = arith.constant 0 : index
    %55 = vector.load %arg5[%c0_23, %c0_24] : memref<16x4xf32, #tpu.memory_space<vmem>>, vector<16x4xf32>
    tpu.vector_store %arg5[%c0_23, %c0_24], %54 {strides = array<i32>} : memref<16x4xf32, #tpu.memory_space<vmem>>, vector<16x4xf32>,
    return
  }
  func.func @transform_0(%arg0: i32) -> (i32, i32) {
    %c0_i32 = arith.constant 0 : i32
    %c0_i32_0 = arith.constant 0 : i32
    return %arg0, %c0_i32 : i32, i32
  }
  func.func @transform_1(%arg0: i32) -> (i32, i32) {
    %c0_i32 = arith.constant 0 : i32
    %c0_i32_0 = arith.constant 0 : i32
    %c0_i32_1 = arith.constant 0 : i32
    return %c0_i32, %c0_i32_0 : i32, i32
  }
  func.func @transform_2(%arg0: i32) -> (i32, i32) {
    %c0_i32 = arith.constant 0 : i32
    %c0_i32_0 = arith.constant 0 : i32
    %c0_i32_1 = arith.constant 0 : i32
    return %c0_i32, %c0_i32_0 : i32, i32
  }
  func.func @transform_3(%arg0: i32) -> (i32, i32, i32) {
    %c0_i32 = arith.constant 0 : i32
    %c0_i32_0 = arith.constant 0 : i32
    %c0_i32_1 = arith.constant 0 : i32
    return %c0_i32, %arg0, %c0_i32_0 : i32, i32, i32
  }
  func.func @transform_4(%arg0: i32) -> (i32, i32) {
    %c0_i32 = arith.constant 0 : i32
    %c0_i32_0 = arith.constant 0 : i32
    return %arg0, %c0_i32 : i32, i32
  }
}

</mosaic_0001>

<bundles_post_ra>
// kernel: tpu_custom_call.1
= control target key start
LH: loop header
LB: loop body
LE: loop exit
PB: predicated region body
PF: predicated region fallthrough
CT: control target
= control target key end

     0   :  { %9 = vsyncpa [#allocation3], 0  ;;  %s1320_s0 = inlined_call_operand.hbm [shape: f32[64,512], index: 0, kind: input, shape index: {}]   ;;  %s1321_s1 = inlined_call_operand.hbm [shape: f32[512,128], index: 1, kind: input, shape index: {}]   ;;  %s1322_s2 = inlined_call_operand.vmem [shape: f32[1,128], index: 2, kind: input, shape index: {}]   ;;  %s1323_s3 = inlined_call_operand.hbm [shape: f32[4,64,128], index: 3, kind: input, shape index: {}]   ;;  %s1324_s4 = inlined_call_operand.vmem [shape: f32[64,4], index: 4, kind: output, shape index: {}]  }
   0x1   :  { %11 = vsyncpa [#allocation3 + $0x1], 0 }
   0x2   :  { %12 = vsyncpa [#allocation5], 0  ;;  %s1121_s15 = smov 0   ;;  %s1123_s16 = smov 0  }
   0x3   :  { %s1125_s17 = smov 0   ;;  %s1127_s18 = smov 0  }
   0x4 LB: > { %s1140_s19 = sadd.s32 4294967295, %s1082_s18   ;;  %s1143_s20 = sadd.s32 1, %s1082_s18   ;;  %s1082_s18 = sphi %s1127_s18, %s1341_s18   ;;  %s1078_s17 = sphi %s1125_s17, %s1340_s17   ;;  %s1074_s16 = sphi %s1123_s16, %s1339_s16   ;;  %s1070_s15 = sphi %s1121_s15, %s1338_s15  }
   0x5   : > { %s22_s21 = ssub.s32 %s1082_s18, %s1143_s20  ;;  %s25_s22 = sadd.s32 1, %s1078_s17 }
   0x6   : > { %p23_p0 = scmp.eq.s32.totalorder %s22_s21, 0  ;;  %p32_p1 = scmp.ne.s32.totalorder %s1078_s17, %s1074_s16 }
   0x7   : > { %p33_p2 = scmp.eq.s32.totalorder %s1082_s18, 0  ;;  %p38_p3 = scmp.ne.s32.totalorder %s1074_s16, %s1070_s15 }
   0x8   : > { %s1153_s23 = scalar_select %p23_p0, %s1078_s17, %s25_s22  }
   0x9   : > { %p1155_p4 = por %p33_p2, %p32_p1  ;;  %p1325_p5 = scmp.eq.s32.totalorder %s1140_s19, 0 }
   0xa   : > { %p730_p6 = scmp.ge.s32.totalorder %s1082_s18, 1  ;;  %p143_p7 = scmp.lt.s32.totalorder %s1082_s18, 5 }
   0xb   : > { %s1329_s24 = scalar_select %p1155_p4, 1, 0 }
   0xc   : > { %p1164_p8 = por %p1325_p5, %p38_p3  ;;  %p1168_p9 = pnand %p730_p6, %p143_p7 }
   0xd   : > { %s1084_s27 = smov [#allocation4]   ;;  %s984_s6 = scalar_lea.hbm %s1321_s1, 8192 }
   0xe   : > { %s1330_s25 = scalar_select %p1164_p8, 1, 0 }
   0xf   : > { %s1331_s26 = scalar_select %p1168_p9, 1, 0 }
  0x10   : > { %s155_s28 = sshll.u32 %s1084_s27, 4  ;;  %p915_p10 = pneg %p1168_p9  ;;  %s156_s28 = int_to_ptr.vmem [resolvable:$true] %s155_s28 }
  0x11   : > { %p985_p12 = scmp.ne.s32.totalorder %s1321_s1, %s984_s6  ;;  %p991_p2 = scmp.lt.u32.totalorder %s984_s6, %s1321_s1 }
  0x12   : > { %p1176_p11 = pnand %p915_p10, %p1325_p5 }
  0x14   : > { %p986_p13 = pneg %p1176_p11 }
  0x16   : > { %p987_p0 = pnand %p986_p13, %p985_p12 }
  0x18   : > { %p988_p1 = pneg %p987_p0 }
  0x1a   : > { %p993_p3 = pnand %p991_p2, %p988_p1 }
  0x1c   : > { %996 = shalt.err (!%p993_p3)
}
  0x1d   : > { %s997_s11 = scalar_lea.vmem %s156_s28, 8192  ;;  %p1005_p5 = scmp.lt.s32.totalorder %s156_s28, %s156_s28 }
  0x1e   : > { %p998_p6 = scmp.ne.s32.totalorder %s156_s28, %s997_s11  ;;  %p1006_p8 = scmp.lt.s32.totalorder %s997_s11, %s997_s11 }
  0x20   : > { %p1000_p7 = pnand %p998_p6, %p986_p13  ;;  %p1007_p9 = por %p1006_p8, %p1005_p5 }
  0x22   : > { %p1001_p10 = pneg %p1000_p7 }
  0x24   : > { %p1008_p4 = pnand %p1007_p9, %p1001_p10 }
  0x26   : > { %1011 = shalt.err (!%p1008_p4)
}
  0x27   : > { %s1085_s12 = smov 128   ;;  %s1086_s13 = smov 8  }
  0x28   : > { %918 = dma.hbm_to_vmem [thread:$0]  (!%p1176_p11), %s1321_s1, 8192, %s156_s28, [#allocation5], %s1085_s12, %s1085_s12, %s1086_s13  }
  0x29   : > { %p732_p12 = scmp.ge.s32.totalorder %s1082_s18, 4 }
  0x2a   : > { %s172_s21 = sand.u32 (!%p732_p12), 1, %s1082_s18   ;;  %s174_s22 = sand.u32 (!%p732_p12), 1, %s1078_s17  }
  0x2b   : > { %168 = sbr.rel (%p732_p12) target bundleno = 83 (0x53), region = 24  ;;  %s1199_s27 = sshll.u32 (!%p732_p12), %s174_s22, 6 }
  0x2c   : > { %s758_s30 = sshll.u32 (!%p732_p12), %s1082_s18, 10  ;;  %s176_s28 = scalar_lea.vmem (!%p732_p12), [#allocation2], %s1199_s27 }
  0x2d   : > { %s1205_s29 = scalar_lea.hbm (!%p732_p12), %s1320_s0, %s758_s30  ;;  %s184_s7 = sshll.u32 (!%p732_p12), %s176_s28, 4  ;;  %s1208_s7 = int_to_ptr.vmem [resolvable:$true] %s184_s7 }
  0x2e   : > { %s1210_s8 = scalar_lea.sflag (!%p732_p12), [#allocation3], %s172_s21  ;;  %s1012_s9 = scalar_lea.hbm (!%p732_p12), %s1205_s29, 1024 }
  0x2f   : > { %p1013_p4 = scmp.ne.s32.totalorder (!%p732_p12), %s1205_s29, %s1012_s9  ;;  %p1333_p5 = scmp.ne.s32.totalorder (!%p732_p12), %s1329_s24, 0 }
  0x30   : > { %s1016_s12 = scalar_lea.hbm (!%p732_p12), %s1320_s0, 4096  ;;  %p1017_p11 = scmp.lt.u32.totalorder (!%p732_p12), %s1205_s29, %s1320_s0 }
  0x31   : > { %p1014_p8 = pnand (!%p732_p12), %p1013_p4, %p1333_p5  ;;  %p1018_p13 = scmp.lt.u32.totalorder (!%p732_p12), %s1016_s12, %s1012_s9 }
  0x32   : > { %p1020_p1 = scmp.lt.u32.totalorder %s1012_s9, %s1205_s29 }
  0x33   : > { %p1015_p9 = pneg %p1014_p8  ;;  %p1019_p0 = por %p1018_p13, %p1017_p11 }
  0x35   : > { %p1021_p2 = por %p1020_p1, %p1019_p0 }
  0x37   : > { %p1022_p3 = pnand %p1021_p2, %p1015_p9 }
  0x39   : > { %1025 = shalt.err (!%p1022_p3)
}
  0x3a   : > { %s1026_s15 = scalar_lea.vmem %s1208_s7, 1024  ;;  %s1087_s21 = smov [#allocation2]  }
  0x3b   : > { %p1027_p6 = scmp.ne.s32.totalorder %s1208_s7, %s1026_s15  ;;  %s1030_s22 = sshll.u32 %s1087_s21, 4  ;;  %s1031_s22 = int_to_ptr.vmem [resolvable:$false] %s1030_s22 }
  0x3c   : > { %s1032_s30 = scalar_lea.vmem %s1031_s22, 2048  ;;  %p1033_p12 = scmp.lt.s32.totalorder %s1208_s7, %s1031_s22 }
  0x3d   : > { %p1028_p7 = pnand %p1027_p6, %p1333_p5  ;;  %p1034_p4 = scmp.lt.s32.totalorder %s1032_s30, %s1026_s15 }
  0x3f   : > { %p1029_p10 = pneg %p1028_p7  ;;  %p1035_p8 = por %p1034_p4, %p1033_p12 }
  0x41   : > { %p1036_p11 = pnand %p1035_p8, %p1029_p10 }
  0x43   : > { %1039 = shalt.err (!%p1036_p11)
}
  0x44   : > { %s1088_s5 = smov 512   ;;  %s1089_s6 = smov 32  }
  0x45   : > { %902 = dma.hbm_to_vmem [thread:$0]  (%p1333_p5), %s1205_s29, 1024, %s1208_s7, %s1210_s8, %s1088_s5, %s1088_s5, %s1089_s6  }
  0x46   : > { %s759_s28 = sshll.u32 %s1082_s18, 8  ;;  %s198_s13 = scalar_lea.vmem [#allocation6], %s1199_s27 }
  0x47   : > { %s204_s11 = scalar_lea.hbm %s1323_s3, %s759_s28  ;;  %s217_s14 = sshll.u32 %s198_s13, 4  ;;  %s218_s14 = int_to_ptr.vmem [resolvable:$true] %s217_s14 }
  0x48   : > { %s903_s12 = scalar_select %p1333_p5, [#allocation0], [#allocation9] }
  0x49   : > { %s1090_s29 = smov 1024   ;;  %s1091_s7 = smov 256  }
  0x4a   : > { %s209_s15 = sld [smem:[%s903_s12]]   ;;  %s1092_s21 = smov 2  }
  0x4b   : > { %904 = sst [smem:[#allocation8]] (%p1333_p5), %s1090_s29  ;;  %s1093_s18 = smov 128  }
  0x4c   : > { %905 = sst [smem:[#allocation8 + $0x1]] (%p1333_p5), %s1091_s7  ;;  %s1094_s22 = smov 8  }
  0x4d   : > { %906 = sst [smem:[#allocation8 + $0x2]] (%p1333_p5), %s1092_s21  ;;  %s1095_s5 = smov [#allocation7]  }
  0x4e   : > { %907 = sst [smem:[#allocation8 + $0x3]] (%p1333_p5), %s1093_s18 }
  0x4f   : > { %908 = sst [smem:[#allocation8 + $0x4]] (%p1333_p5), %s1093_s18 }
  0x50   : > { %s740_s27 = sshll.u32 %s209_s15, 26  ;;  %909 = sst [smem:[#allocation8 + $0x5]] (%p1333_p5), %s1094_s22 }
  0x51   : > { %s741_s30 = sadd.s32 134217728, %s740_s27 }
  0x52   : > { %910 = dma.general (%p1333_p5), %s204_s11, 1024, %s218_s14, %s1210_s8, %s1095_s5, [#allocation8], %s741_s30, 0  }
  0x53 PF: > { %p1334_p9 = scmp.ne.s32.totalorder %s1331_s26, 0 }
  0x54   : > { %s244_s6 = sand.u32 (!%p1334_p9), 1, %s1140_s19   ;;  %s246_s28 = sand.u32 (!%p1334_p9), 1, %s1074_s16  }
  0x55   : > { %242 = sbr.rel (%p1334_p9) target bundleno = 532 (0x214), region = 36  ;;  %s743_s9 = sshll.u32 (!%p1334_p9), %s246_s28, 6 }
  0x56   : > { %s245_s10 = scalar_lea.sflag (!%p1334_p9), [#allocation3], %s244_s6  ;;  %s1260_s12 = scalar_lea.vmem (!%p1334_p9), [#allocation2], %s743_s9 }
  0x57   : > { %p1335_p13 = scmp.ne.s32.totalorder (!%p1334_p9), %s1330_s25, 0 }
  0x5c   : > { %1057 = dma.done.wait (%p1335_p13), %s245_s10, 1024  }
  0x5d   : > { %1059 = vsyncadd (%p1335_p13), %s245_s10, 4294966272  ;;  %p1336_p5 = scmp.eq.s32.totalorder %s1140_s19, 0 }
  0x5f   : > { %1061 = dma.done.wait (%p1336_p5), [#allocation5], 8192   ;;  %p1337_p0 = pmov %p1336_p5 }
  0x60   : > { %s1270_s24 = scalar_lea.vmem [#allocation6], %s743_s9 }
  0x61   : > { %1063 = vsyncadd (%p1337_p0), [#allocation5], 4294959104 }
  0x62   : > { %1065 = dma.done.wait (%p1335_p13), %s245_s10, 1024  }
  0x63   : > { %1067 = vsyncadd (%p1335_p13), %s245_s10, 4294966272  ;;  %v323_v0 = vld [vmem:[#allocation4 + $0x80] sm:$0xff]  ;;  %v324_v1 = vld [vmem:[#allocation4 + $0x88] sm:$0xff]  ;;  %s746_s8 = sshll.u32 %s1140_s19, 1  ;;  %vm619_vm0 = vcmask 7168   ;;  %vm622_vm1 = vcmask 15360  }
  0x64   : > { %v307_v2 = vld [vmem:[#allocation4] sm:$0xff]  ;;  %v836_v3 = vpack.c.bf16 %v324_v1, %v323_v0  ;;  %v308_v4 = vld [vmem:[#allocation4 + $0x8] sm:$0xff]  ;;  %v325_v11 = vld [vmem:[#allocation4 + $0x90] sm:$0xff]  ;;  %p294_p1 = scmp.lt.s32.totalorder %s746_s8, 7  ;;  %vm625_vm2 = vcmask 23552   ;;  %vm628_vm3 = vcmask 31744  }
  0x65   : > { %v355_v5 = vld [vmem:[#allocation4 + $0x180] sm:$0xff]  ;;  %v356_v6 = vld [vmem:[#allocation4 + $0x188] sm:$0xff]  ;;  %v838_v7 = vpack.c.bf16 %v308_v4, %v307_v2  ;;  %v326_v13 = vld [vmem:[#allocation4 + $0x98] sm:$0xff] }
  0x66   : > { %v868_v8 = vpack.c.bf16 %v356_v6, %v355_v5  ;;  %v339_v9 = vld [vmem:[#allocation4 + $0x100] sm:$0xff]  ;;  %v340_v10 = vld [vmem:[#allocation4 + $0x108] sm:$0xff]  ;;  %837 = vmatprep.subr.bf16.mxu0 %v836_v3  ;;  %v309_v14 = vld [vmem:[#allocation4 + $0x10] sm:$0xff]  ;;  %v840_v16 = vpack.c.bf16 %v326_v13, %v325_v11  ;;  %s1343_s8 = smov (!%p294_p1, %s746_s8), 7 }
  0x67   : > { %v870_v12 = vpack.c.bf16 %v340_v10, %v339_v9  ;;  %v310_v15 = vld [vmem:[#allocation4 + $0x18] sm:$0xff]  ;;  %839 = vmatpush3.bf16.msra.mxu0 %v838_v7  ;;  %v357_v18 = vld [vmem:[#allocation4 + $0x190] sm:$0xff]  ;;  %v327_v23 = vld [vmem:[#allocation4 + $0xa0] sm:$0xff]  ;;  %s747_s19 = sshll.u32 %s1343_s8, 3 }
  0x68   : > { %869 = vmatprep.subr.bf16.mxu1 %v868_v8  ;;  %v842_v17 = vpack.c.bf16 %v310_v15, %v309_v14  ;;  %v358_v19 = vld [vmem:[#allocation4 + $0x198] sm:$0xff]  ;;  %v341_v20 = vld [vmem:[#allocation4 + $0x110] sm:$0xff]  ;;  %v328_v24 = vld [vmem:[#allocation4 + $0xa8] sm:$0xff]  ;;  %841 = vmatprep.subr.bf16.mxu0 %v840_v16  ;;  %s297_s14 = scalar_lea.vmem %s1324_s4, %s747_s19 }
  0x69   : > { %871 = vmatpush3.bf16.msra.mxu1 %v870_v12  ;;  %v872_v21 = vpack.c.bf16 %v358_v19, %v357_v18  ;;  %v342_v22 = vld [vmem:[#allocation4 + $0x118] sm:$0xff]  ;;  %v844_v26 = vpack.c.bf16 %v328_v24, %v327_v23  ;;  %v311_v27 = vld [vmem:[#allocation4 + $0x20] sm:$0xff]  ;;  %v312_v28 = vld [vmem:[#allocation4 + $0x28] sm:$0xff] }
  0x6a   : > { %v874_v25 = vpack.c.bf16 %v342_v22, %v341_v20  ;;  %v359_v29 = vld [vmem:[#allocation4 + $0x1a0] sm:$0xff]  ;;  %v360_v30 = vld [vmem:[#allocation4 + $0x1a8] sm:$0xff]  ;;  %v846_v33 = vpack.c.bf16 %v312_v28, %v311_v27  ;;  %v329_v35 = vld [vmem:[#allocation4 + $0xb0] sm:$0xff] }
  0x6b   : > { %873 = vmatprep.subr.bf16.mxu1 %v872_v21  ;;  %v343_v31 = vld [vmem:[#allocation4 + $0x120] sm:$0xff]  ;;  %v344_v32 = vld [vmem:[#allocation4 + $0x128] sm:$0xff]  ;;  %843 = vmatpush3.bf16.msra.mxu0 %v842_v17  ;;  %v876_v34 = vpack.c.bf16 %v360_v30, %v359_v29  ;;  %v330_v36 = vld [vmem:[#allocation4 + $0xb8] sm:$0xff] }
  0x6c   : > { %v313_v37 = vld [vmem:[#allocation4 + $0x30] sm:$0xff]  ;;  %845 = vmatprep.subr.bf16.mxu0 %v844_v26  ;;  %v878_v38 = vpack.c.bf16 %v344_v32, %v343_v31  ;;  %v848_v39 = vpack.c.bf16 %v330_v36, %v329_v35  ;;  %v314_v40 = vld [vmem:[#allocation4 + $0x38] sm:$0xff]  ;;  %v331_v46 = vld [vmem:[#allocation4 + $0xc0] sm:$0xff] }
  0x6d   : > { %875 = vmatpush3.bf16.msra.mxu1 %v874_v25  ;;  %v361_v41 = vld [vmem:[#allocation4 + $0x1b0] sm:$0xff]  ;;  %v362_v42 = vld [vmem:[#allocation4 + $0x1b8] sm:$0xff]  ;;  %v332_v47 = vld [vmem:[#allocation4 + $0xc8] sm:$0xff]  ;;  %v850_v48 = vpack.c.bf16 %v314_v40, %v313_v37 }
  0x6e   : > { %877 = vmatprep.subr.bf16.mxu1 %v876_v34  ;;  %v880_v43 = vpack.c.bf16 %v362_v42, %v361_v41  ;;  %v345_v44 = vld [vmem:[#allocation4 + $0x130] sm:$0xff]  ;;  %v346_v45 = vld [vmem:[#allocation4 + $0x138] sm:$0xff]  ;;  %v363_v49 = vld [vmem:[#allocation4 + $0x1c0] sm:$0xff]  ;;  %v852_v52 = vpack.c.bf16 %v332_v47, %v331_v46 }
  0x6f   : > { %847 = vmatpush3.bf16.msra.mxu0 %v846_v33  ;;  %v364_v50 = vld [vmem:[#allocation4 + $0x1c8] sm:$0xff]  ;;  %v882_v51 = vpack.c.bf16 %v346_v45, %v345_v44  ;;  %v315_v53 = vld [vmem:[#allocation4 + $0x40] sm:$0xff]  ;;  %v333_v58 = vld [vmem:[#allocation4 + $0xd0] sm:$0xff] }
  0x70   : > { %849 = vmatprep.subr.bf16.mxu0 %v848_v39  ;;  %v316_v54 = vld [vmem:[#allocation4 + $0x48] sm:$0xff]  ;;  %v347_v55 = vld [vmem:[#allocation4 + $0x140] sm:$0xff]  ;;  %v884_v56 = vpack.c.bf16 %v364_v50, %v363_v49  ;;  %v334_v59 = vld [vmem:[#allocation4 + $0xd8] sm:$0xff] }
  0x71   : > { %879 = vmatpush3.bf16.msra.mxu1 %v878_v38  ;;  %v348_v57 = vld [vmem:[#allocation4 + $0x148] sm:$0xff]  ;;  %v365_v60 = vld [vmem:[#allocation4 + $0x1d0] sm:$0xff]  ;;  %v366_v61 = vld [vmem:[#allocation4 + $0x1d8] sm:$0xff]  ;;  %v854_v62 = vpack.c.bf16 %v316_v54, %v315_v53  ;;  %v856_v0 = vpack.c.bf16 %v334_v59, %v333_v58 }
  0x72   : > { %881 = vmatprep.subr.bf16.mxu1 %v880_v43  ;;  %v886_v63 = vpack.c.bf16 %v348_v57, %v347_v55  ;;  %v317_v1 = vld [vmem:[#allocation4 + $0x50] sm:$0xff]  ;;  %v318_v2 = vld [vmem:[#allocation4 + $0x58] sm:$0xff]  ;;  %v888_v4 = vpack.c.bf16 %v366_v61, %v365_v60  ;;  %v335_v6 = vld [vmem:[#allocation4 + $0xe0] sm:$0xff] }
  0x73   : > { %851 = vmatpush3.bf16.msra.mxu0 %v850_v48  ;;  %v349_v3 = vld [vmem:[#allocation4 + $0x150] sm:$0xff]  ;;  %v350_v5 = vld [vmem:[#allocation4 + $0x158] sm:$0xff]  ;;  %v336_v7 = vld [vmem:[#allocation4 + $0xe8] sm:$0xff]  ;;  %v858_v10 = vpack.c.bf16 %v318_v2, %v317_v1 }
  0x74   : > { %853 = vmatprep.subr.bf16.mxu0 %v852_v52  ;;  %v367_v8 = vld [vmem:[#allocation4 + $0x1e0] sm:$0xff]  ;;  %v368_v9 = vld [vmem:[#allocation4 + $0x1e8] sm:$0xff]  ;;  %v890_v13 = vpack.c.bf16 %v350_v5, %v349_v3  ;;  %v860_v14 = vpack.c.bf16 %v336_v7, %v335_v6  ;;  %v337_v19 = vld [vmem:[#allocation4 + $0xf0] sm:$0xff] }
  0x75   : > { %883 = vmatpush3.bf16.msra.mxu1 %v882_v51  ;;  %v319_v11 = vld [vmem:[#allocation4 + $0x60] sm:$0xff]  ;;  %v320_v12 = vld [vmem:[#allocation4 + $0x68] sm:$0xff]  ;;  %v892_v18 = vpack.c.bf16 %v368_v9, %v367_v8  ;;  %v338_v20 = vld [vmem:[#allocation4 + $0xf8] sm:$0xff] }
  0x76   : > { %885 = vmatprep.subr.bf16.mxu1 %v884_v56  ;;  %v351_v15 = vld [vmem:[#allocation4 + $0x160] sm:$0xff]  ;;  %v352_v16 = vld [vmem:[#allocation4 + $0x168] sm:$0xff]  ;;  %v302_v21 = vld [vmem:[%s1260_s12 + $0x18] sm:$0xff]  ;;  %v862_v24 = vpack.c.bf16 %v320_v12, %v319_v11  ;;  %v864_v26 = vpack.c.bf16 %v338_v20, %v337_v19 }
  0x77   : > { %855 = vmatpush3.bf16.msra.mxu0 %v854_v62  ;;  %v300_v17 = vld [vmem:[%s1260_s12 + $0x8] sm:$0xff]  ;;  %v369_v22 = vld [vmem:[#allocation4 + $0x1f0] sm:$0xff]  ;;  %v370_v23 = vld [vmem:[#allocation4 + $0x1f8] sm:$0xff]  ;;  %517 = vmatprep.mubr.f32.mxu1 %v302_v21  ;;  %v894_v25 = vpack.c.bf16 %v352_v16, %v351_v15 }
  0x78   : > { %857 = vmatprep.subr.bf16.mxu0 %v856_v0  ;;  %442 = vmatprep.mubr.f32.mxu0 %v300_v17  ;;  %v321_v27 = vld [vmem:[#allocation4 + $0x70] sm:$0xff]  ;;  %v322_v28 = vld [vmem:[#allocation4 + $0x78] sm:$0xff]  ;;  %v896_v29 = vpack.c.bf16 %v370_v23, %v369_v22  ;;  %v299_v34 = vld [vmem:[%s1260_s12] sm:$0xff] }
  0x79   : > { %887 = vmatpush3.bf16.msra.mxu1 %v886_v63  ;;  %v353_v30 = vld [vmem:[#allocation4 + $0x170] sm:$0xff]  ;;  %v354_v31 = vld [vmem:[#allocation4 + $0x178] sm:$0xff]  ;;  %v866_v32 = vpack.c.bf16 %v322_v28, %v321_v27  ;;  %v304_v36 = vld [vmem:[%s1260_s12 + $0x28] sm:$0xff] }
  0x7a   : > { %889 = vmatprep.subr.bf16.mxu1 %v888_v4  ;;  %v898_v33 = vpack.c.bf16 %v354_v31, %v353_v30  ;;  %v301_v35 = vld [vmem:[%s1260_s12 + $0x10] sm:$0xff]  ;;  %v306_v37 = vld [vmem:[%s1260_s12 + $0x38] sm:$0xff]  ;;  %v303_v38 = vld [vmem:[%s1260_s12 + $0x20] sm:$0xff] }
  0x7b   : > { %859 = vmatpush3.bf16.msra.mxu0 %v858_v10  ;;  %v305_v39 = vld [vmem:[%s1260_s12 + $0x30] sm:$0xff]  ;;  %v536_v40 = vld [vmem:[%s1270_s24] sm:$0xff]  ;;  %v537_v43 = vld [vmem:[%s1270_s24 + $0x8] sm:$0xff] }
  0x7c   : > { %861 = vmatprep.subr.bf16.mxu0 %v860_v14  ;;  %v544_v41 = vmul.f32 %v536_v40, %v536_v40  ;;  %v749_v42 = vld [vmem:[%s1270_s24 + $0x10] sm:$0xff]  ;;  %v545_v45 = vmul.f32 %v537_v43, %v537_v43  ;;  %v750_v46 = vld [vmem:[%s1270_s24 + $0x18] sm:$0xff]  ;;  %v751_v47 = vld [vmem:[%s1270_s24 + $0x20] sm:$0xff] }
  0x7d   : > { %891 = vmatpush3.bf16.msra.mxu1 %v890_v13  ;;  %v565_v44 = vmul.f32 %v749_v42, %v749_v42  ;;  %v566_v48 = vmul.f32 %v750_v46, %v750_v46  ;;  %v586_v49 = vmul.f32 %v751_v47, %v751_v47  ;;  %v752_v50 = vld [vmem:[%s1270_s24 + $0x28] sm:$0xff]  ;;  %v753_v51 = vld [vmem:[%s1270_s24 + $0x30] sm:$0xff]  ;;  %v754_v54 = vld [vmem:[%s1270_s24 + $0x38] sm:$0xff] }
  0x7e   : > { %893 = vmatprep.subr.bf16.mxu1 %v892_v18  ;;  %546 = vadd.xlane.f32.xlu0 %v544_v41  ;;  %v587_v52 = vmul.f32 %v752_v50, %v752_v50  ;;  %v607_v53 = vmul.f32 %v753_v51, %v753_v51  ;;  %v608_v55 = vmul.f32 %v754_v54, %v754_v54  ;;  %v748_v57 = vld [vmem:[%s1322_s2] ss:$0 sm:$0xff] }
  0x7f   : > { %863 = vmatpush3.bf16.msra.mxu0 %v862_v24  ;;  %567 = vadd.xlane.f32.xlu1 %v565_v44 }
  0x80   : > { %865 = vmatprep.subr.bf16.mxu0 %v864_v26 }
  0x81   : > { %895 = vmatpush3.bf16.msra.mxu1 %v894_v25 }
  0x82   : > { %897 = vmatprep.subr.bf16.mxu1 %v896_v29  ;;  %548 = vadd.xlane.f32.xlu0 %v545_v45 }
  0x83   : > { %867 = vmatpush3.bf16.msra.mxu0 %v866_v32  ;;  %569 = vadd.xlane.f32.xlu1 %v566_v48 }
  0x85   : > { %899 = vmatpush3.bf16.msra.mxu1 %v898_v33 }
  0x86   : > { %443 = vmatmul.mubr.f32.vlgmr.msra.gmra.mrb[0].mxu0 %v299_v34  ;;  %588 = vadd.xlane.f32.xlu0 %v586_v49 }
  0x87   : > { %447 = vmatprep.mubr.f32.mxu0 %v304_v36  ;;  %590 = vadd.xlane.f32.xlu1 %v587_v52 }
  0x88   : > { %518 = vmatmul.mubr.f32.vlgmr.msra.gmra.mrb[0].mxu1 %v301_v35 }
  0x89   : > { %522 = vmatprep.mubr.f32.mxu1 %v306_v37 }
  0x8a   : > { %448 = vmatmul.mubr.f32.gmra.mrb[2].mxu0 %v303_v38  ;;  %609 = vadd.xlane.f32.xlu0 %v607_v53 }
  0x8b   : > { %611 = vadd.xlane.f32.xlu1 %v608_v55 }
  0x8c   : > { %523 = vmatmul.mubr.f32.gmra.mrb[2].mxu1 %v305_v39 }
 0x10b   : > { %v547_v21 = vpop.xlane.xlu0 %546 }
 0x10c   : > { %v568_v22 = vpop.xlane.xlu1 %567 }
 0x10f   : > { %v549_v23 = vpop.xlane.xlu0 %548 }
 0x110   : > { %v570_v24 = vpop.xlane.xlu1 %569 }
 0x113   : > { %v589_v25 = vpop.xlane.xlu0 %588 }
 0x114   : > { %v591_v26 = vpop.xlane.xlu1 %590 }
 0x117   : > { %v610_v27 = vpop.xlane.xlu0 %609 }
 0x118   : > { %v612_v28 = vpop.xlane.xlu1 %611 }
 0x159   : > { %v792_v56 = vpop.f32.mrb[0].mxu0 }
 0x15a   : > { %v793_v58 = vpop.f32.mrb[1].mxu0 }
 0x15b   : > { %v830_v59 = vpop.f32.mrb[0].mxu1  ;;  %v794_v60 = vadd.f32 %v793_v58, %v792_v56 }
 0x15c   : > { %v831_v61 = vpop.f32.mrb[1].mxu1 }
 0x15d   : > { %v832_v62 = vadd.f32 %v831_v61, %v830_v59  ;;  %v445_v63 = vadd.f32 %v794_v60, %v748_v57  ;;  %v795_v0 = vpop.f32.mrb[2].mxu0 }
 0x15e   : > { %v796_v1 = vpop.f32.mrb[3].mxu0 }
 0x15f   : > { %v833_v2 = vpop.f32.mrb[2].mxu1  ;;  %v520_v3 = vadd.f32 %v832_v62, %v445_v63  ;;  %v797_v4 = vadd.f32 %v796_v1, %v795_v0 }
 0x160   : > { %v834_v5 = vpop.f32.mrb[3].mxu1 }
 0x161   : > { %v835_v6 = vadd.f32 %v834_v5, %v833_v2  ;;  %964 = vtanh.f32 %v520_v3  ;;  %v450_v7 = vadd.f32 %v797_v4, %v748_v57 }
 0x163   : > { %v525_v8 = vadd.f32 %v835_v6, %v450_v7 }
 0x165   : > { %966 = vtanh.f32 %v525_v8 }
 0x16b   : > { %v965_v9 = vpop.eup %964 }
 0x16c   : > { %v530_v10 = vmul.f32 %v965_v9, %v965_v9  ;;  %v538_v13 = vmul.f32 %v965_v9, %v536_v40  ;;  %v559_v14 = vmul.f32 %v965_v9, %v749_v42  ;;  %v580_v15 = vmul.f32 %v965_v9, %v751_v47 }
 0x16d   : > { %v601_v19 = vmul.f32 %v965_v9, %v753_v51 }
 0x16e   : > { %532 = vadd.xlane.f32.xlu0 %v530_v10 }
 0x16f   : > { %v967_v11 = vpop.eup %966 }
 0x170   : > { %v531_v12 = vmul.f32 %v967_v11, %v967_v11  ;;  %v560_v16 = vmul.f32 %v967_v11, %v750_v46  ;;  %v539_v17 = vmul.f32 %v967_v11, %v537_v43  ;;  %v581_v18 = vmul.f32 %v967_v11, %v752_v50 }
 0x171   : > { %v602_v20 = vmul.f32 %v967_v11, %v754_v54 }
 0x172   : > { %534 = vadd.xlane.f32.xlu1 %v531_v12  ;;  %540 = vadd.xlane.f32.xlu0 %v538_v13 }
 0x176   : > { %561 = vadd.xlane.f32.xlu1 %v559_v14  ;;  %582 = vadd.xlane.f32.xlu0 %v580_v15 }
 0x17a   : > { %563 = vadd.xlane.f32.xlu1 %v560_v16  ;;  %542 = vadd.xlane.f32.xlu0 %v539_v17 }
 0x17e   : > { %584 = vadd.xlane.f32.xlu1 %v581_v18  ;;  %603 = vadd.xlane.f32.xlu0 %v601_v19 }
 0x182   : > { %605 = vadd.xlane.f32.xlu1 %v602_v20 }
 0x1fb   : > { %v533_v29 = vpop.xlane.xlu0 %532 }
 0x1fc   : > { %v550_v30 = vmul.f32 %v547_v21, %v533_v29  ;;  %v571_v31 = vmul.f32 %v568_v22, %v533_v29  ;;  %v592_v32 = vmul.f32 %v589_v25, %v533_v29  ;;  %v613_v33 = vmul.f32 %v610_v27, %v533_v29 }
 0x1fe   : > { %968 = vrsqrt.f32 %v550_v30 }
 0x1ff   : > { %970 = vrsqrt.f32 %v571_v31  ;;  %v535_v34 = vpop.xlane.xlu1 %534  ;;  %v541_v35 = vpop.xlane.xlu0 %540 }
 0x200   : > { %972 = vrsqrt.f32 %v592_v32  ;;  %v551_v36 = vmul.f32 %v549_v23, %v535_v34  ;;  %v572_v37 = vmul.f32 %v570_v24, %v535_v34  ;;  %v593_v38 = vmul.f32 %v591_v26, %v535_v34 }
 0x201   : > { %974 = vrsqrt.f32 %v613_v33  ;;  %v614_v39 = vmul.f32 %v612_v28, %v535_v34 }
 0x202   : > { %976 = vrsqrt.f32 %v551_v36 }
 0x203   : > { %978 = vrsqrt.f32 %v572_v37  ;;  %v562_v40 = vpop.xlane.xlu1 %561  ;;  %v583_v41 = vpop.xlane.xlu0 %582 }
 0x204   : > { %980 = vrsqrt.f32 %v593_v38 }
 0x205   : > { %982 = vrsqrt.f32 %v614_v39 }
 0x207   : > { %v564_v42 = vpop.xlane.xlu1 %563  ;;  %v543_v43 = vpop.xlane.xlu0 %542 }
 0x208   : > { %v969_v44 = vpop.eup %968 }
 0x209   : > { %v971_v45 = vpop.eup %970  ;;  %v554_v46 = vmul.f32 %v969_v44, %v541_v35 }
 0x20a   : > { %v973_v47 = vpop.eup %972  ;;  %v575_v48 = vmul.f32 %v971_v45, %v562_v40 }
 0x20b   : > { %v975_v49 = vpop.eup %974  ;;  %v596_v50 = vmul.f32 %v973_v47, %v583_v41  ;;  %v585_v51 = vpop.xlane.xlu1 %584 }
 0x20c   : > { %v604_v52 = vpop.xlane.xlu0 %603  ;;  %v977_v53 = vpop.eup %976  ;;  %v620_v54 = vsel %vm619_vm0, %v554_v46, %v575_v48 }
 0x20d   : > { %v617_v55 = vmul.f32 %v975_v49, %v604_v52  ;;  %v979_v56 = vpop.eup %978  ;;  %v623_v57 = vsel %vm622_vm1, %v620_v54, %v596_v50  ;;  %v555_v58 = vmul.f32 %v977_v53, %v543_v43 }
 0x20e   : > { %v981_v59 = vpop.eup %980  ;;  %v576_v60 = vmul.f32 %v979_v56, %v564_v42 }
 0x20f   : > { %v626_v61 = vsel %vm625_vm2, %v623_v57, %v617_v55  ;;  %v983_v62 = vpop.eup %982  ;;  %v597_v63 = vmul.f32 %v981_v59, %v585_v51  ;;  %v606_v0 = vpop.xlane.xlu1 %605 }
 0x210   : > { %629 = vst.msk [vmem:[%s297_s14] sm:$0xff] %vm628_vm3, %v626_v61  ;;  %v621_v1 = vsel %vm619_vm0, %v555_v58, %v576_v60  ;;  %v618_v2 = vmul.f32 %v983_v62, %v606_v0 }
 0x211   : > { %v624_v3 = vsel %vm622_vm1, %v621_v1, %v597_v63 }
 0x212   : > { %v627_v4 = vsel %vm625_vm2, %v624_v3, %v618_v2 }
 0x213   : > { %630 = vst.msk [vmem:[%s297_s14 + $0x8] sm:$0xff] %vm628_vm3, %v627_v4 }
 0x214 PF: > { %p15_p2 = scmp.ge.s32.totalorder %s1143_s20, 6   ;;  %s1338_s15 = smov %s1074_s16 }
 0x215   : > { %s1339_s16 = smov %s1078_s17  ;;  %s1340_s17 = smov %s1153_s23 }
 0x216   : > { %s1341_s18 = smov %s1143_s20  ;;  %17 = sbr.rel (!%p15_p2) target bundleno = 4 (0x4), region = 99 }
 0x21d   :  { %653 = vsyncpa [#allocation3], 1 }
 0x21e   :  { %655 = vsyncpa [#allocation3 + $0x1], 1 }
 0x21f   :  { %656 = vsyncpa [#allocation5], 1 }

</bundles_post_ra>
